<compile_context>
chip_gen: v5e
topology: v5e:2x2
jax: 0.10.0
libtpu: 0.0.40
codegen_flags: <defaults>
</compile_context>

<pallas_src>
import functools

import jax
import jax.numpy as jnp
from jax.experimental import pallas as pl
from jax.experimental.pallas import tpu as pltpu


def _mhda_kernel(x_ref, wqkv_ref, bqkv_ref, wo_ref, bo_ref, hsel_ref, hexp_ref,
                 negmask_ref, o_ref, *, segment_size, seq_len, pad_len, mxu_dtype):
    """Processes one (batch row, block of segments) slab: (1, blk_rows, d_model)."""
    blk_rows = x_ref.shape[1]
    dp = hexp_ref.shape[1]          # lane-padded channel dim (multiple of 128)
    hp = hsel_ref.shape[1]          # lane-padded head dim (multiple of 128)
    n_seg = blk_rows // segment_size

    # Cast x in-kernel (saves a separate host-side HBM pass for the dtype cast).
    x = x_ref[0].astype(mxu_dtype)                                   # (rows, D)

    # Fused QKV projection: one (rows, D) x (D, 3*Dp) MXU GEMM, f32 accumulation.
    qkv = jnp.dot(x, wqkv_ref[...], preferred_element_type=jnp.float32) + bqkv_ref[...]
    q = qkv[:, 0 * dp:1 * dp]                                        # f32 (scaling folded into wq/bq)
    k = qkv[:, 1 * dp:2 * dp]                                        # f32
    v = qkv[:, 2 * dp:3 * dp].astype(mxu_dtype)                      # bf16 (output path only)

    # Per-position per-head dot(Q, K): reduce each head's channel slice on the MXU
    # via a 0/1 selection matrix. Kept entirely in f32 (numerics of the score path).
    scores = jnp.dot(q * k, hsel_ref[...],
                     preferred_element_type=jnp.float32)             # (rows, Hp)

    # Validity of padded rows (reference pads AFTER the projection -> score is 0
    # there). Only needed when padding exists; the dilation-class mask itself is a
    # precomputed resident additive mask (0 / -1e30).
    if pad_len:
        row = jax.lax.broadcasted_iota(jnp.int32, (blk_rows, hp), 0)
        gpos = pl.program_id(1) * blk_rows + row
        scores = jnp.where(gpos < seq_len, scores, 0.0)
    masked = scores + negmask_ref[...]

    # Segment-local softmax over each segment's dilated positions (all in f32).
    m3 = masked.reshape(n_seg, segment_size, hp)
    mx = jnp.max(m3, axis=1, keepdims=True)
    e = jnp.exp(m3 - mx)
    denom = jnp.sum(e, axis=1, keepdims=True)                        # >= 1 always
    probs = (e * pl.reciprocal(denom, approx=True)).reshape(blk_rows, hp)

    # Expand per-head probs to the head's channel slice (exact 0/1 matrix) and
    # scale V. probs is 0 at positions outside a head's dilation class, so this
    # realizes the reference's per-head scatter back to the dilated positions.
    probs_c = jnp.dot(probs.astype(mxu_dtype), hexp_ref[...],
                      preferred_element_type=jnp.float32)            # (rows, Dp)
    head_out = (probs_c * v).astype(wo_ref.dtype)

    out = jnp.dot(head_out, wo_ref[...],
                  preferred_element_type=jnp.float32) + bo_ref[...]
    o_ref[0] = out.astype(o_ref.dtype)


def _vmem_budget_bytes():
    """~75% of this generation's VMEM (v5e/v6e: ~96 MiB, v7x: ~48 MiB)."""
    phys = 64 * 1024 * 1024            # conservative fallback (v7x per-core size)
    try:
        info = pltpu.get_tpu_info()
        cap = getattr(info, "vmem_capacity_bytes", None)
        if cap:
            phys = int(cap)
    except Exception:
        pass
    return int(min(phys * 3 // 4, 100 * 1024 * 1024))


def _max_rows_for_vmem(d_model, dp, hp, x_bytes, out_bytes, budget):
    """Crude per-slab footprint model -> max rows that fit the VMEM budget."""
    const_bytes = (3 * dp * d_model * 2     # fused QKV weight (bf16)
                   + dp * dp * 2            # output weight (bf16)
                   + dp * hp * 4            # hsel (f32)
                   + hp * dp * 2            # hexp (bf16)
                   + 8 * dp * 4)            # biases
    per_row = (2 * x_bytes * d_model        # x block, double-buffered
               + 2 * out_bytes * dp         # out block, double-buffered
               + 3 * dp * 4                 # fused qkv intermediate (f32)
               + 2 * dp * 4                 # q*k, probs_c (f32)
               + 2 * dp * 2                 # v, head_out (bf16)
               + 6 * hp * 4)                # score/softmax temps + negmask
    avail = budget - const_bytes - (4 << 20)   # 4 MiB headroom
    if avail <= 0:
        return 0
    return avail // per_row


def _pick_block_segments(num_segments, segment_size, s_pad, max_block_rows, batch):
    """Largest divisor of num_segments whose row count is a legal, VMEM-friendly tile.

    Prefers blk_rows % 16 == 0 (bf16 sublane packing), then % 8; for batch == 1 it
    prefers >= 2 grid steps so both v7x TensorCores get work.
    """
    for align in (16, 8):
        cands = []
        for d in range(num_segments, 0, -1):
            rows = d * segment_size
            if num_segments % d != 0 or rows > max_block_rows:
                continue
            if rows % align == 0 or rows == s_pad:
                cands.append(d)
        if not cands:
            continue
        if batch == 1:
            for d in cands:
                if num_segments // d >= 2:
                    return d
        return cands[0]
    return num_segments  # whole padded sequence per step (always a legal block)


def multi_head_dilated_attention(x, params, *, num_heads, segment_size, dilation_rate,
                                 mxu_dtype=jnp.bfloat16, out_dtype=jnp.bfloat16,
                                 max_block_rows=1024):
    B, seq_len, d_model = x.shape
    head_dim = d_model // num_heads
    assert head_dim * num_heads == d_model
    scaling = head_dim ** (-0.5)

    pad_len = (-seq_len) % segment_size
    s_pad = seq_len + pad_len
    num_segments = s_pad // segment_size

    # Lane-padded sizes: channel axis (QKV / output) and head axis.
    dp = ((d_model + 127) // 128) * 128
    hp = max(128, ((num_heads + 127) // 128) * 128)

    x_bytes = jnp.dtype(x.dtype).itemsize
    out_bytes = jnp.dtype(out_dtype).itemsize
    vmem_budget = _vmem_budget_bytes()
    cap_rows = _max_rows_for_vmem(d_model, dp, hp, x_bytes, out_bytes, vmem_budget)
    eff_max_rows = max(min(max_block_rows, cap_rows), segment_size)

    blk_segs = _pick_block_segments(num_segments, segment_size, s_pad, eff_max_rows, B)
    blk_rows = blk_segs * segment_size
    num_blocks = num_segments // blk_segs

    # x: pad rows only when needed; dtype cast happens in-kernel.
    x_p = jnp.pad(x, ((0, 0), (0, pad_len), (0, 0))) if pad_len else x

    # Fold 1/sqrt(head_dim) into wq AND bq in f32 (exact for any head_dim).
    wq_s = params["wq"].astype(jnp.float32) * jnp.float32(scaling)
    bq_s = params["bq"].astype(jnp.float32) * jnp.float32(scaling)

    def _pad_cols(w_t):  # (D, D) -> (D, Dp), zero-pad output columns
        return jnp.pad(w_t, ((0, 0), (0, dp - d_model)))

    w_qkv_t = jnp.concatenate(
        [_pad_cols(wq_s.T), _pad_cols(params["wk"].T), _pad_cols(params["wv"].T)],
        axis=1).astype(mxu_dtype)                                    # (D, 3*Dp)
    b_qkv = jnp.concatenate(
        [jnp.pad(bq_s, (0, dp - d_model)),
         jnp.pad(params["bk"], (0, dp - d_model)),
         jnp.pad(params["bv"], (0, dp - d_model))]
    ).reshape(1, 3 * dp).astype(jnp.float32)
    wo_t = jnp.pad(params["wo"].T, ((0, dp - d_model), (0, dp - d_model))
                   ).astype(mxu_dtype)                               # (Dp, Dp)
    bo = jnp.pad(params["bo"], (0, dp - d_model)).reshape(1, dp).astype(jnp.float32)

    # Head selection (f32, for the f32 score reduction) / expansion (bf16, 0/1)
    # matrices. Heads with no in-class position (offset >= segment_size) and padded
    # heads produce exactly zero output via zeroed hexp rows.
    chan = jnp.arange(dp)
    heads = jnp.arange(hp)
    head_of_chan = chan // head_dim
    real_chan = chan < d_model
    ok_head = (heads < num_heads) & ((heads % dilation_rate) < segment_size)
    hsel = ((head_of_chan[:, None] == heads[None, :]) & real_chan[:, None]
            ).astype(jnp.float32)                                    # (Dp, Hp)
    hexp = ((heads[:, None] == head_of_chan[None, :]) & ok_head[:, None]
            & real_chan[None, :]).astype(mxu_dtype)                  # (Hp, Dp)

    # Grid-invariant dilation-class additive mask (0 where in-class, -1e30 else).
    rowi = jnp.arange(blk_rows)[:, None]
    headi = jnp.arange(hp)[None, :]
    in_class = ((((rowi % segment_size) % dilation_rate) == (headi % dilation_rate))
                & (headi < num_heads) & ((headi % dilation_rate) < segment_size))
    negmask = jnp.where(in_class, 0.0, -1e30).astype(jnp.float32)    # (blk_rows, Hp)

    kernel = functools.partial(
        _mhda_kernel, segment_size=segment_size, seq_len=seq_len, pad_len=pad_len,
        mxu_dtype=mxu_dtype)
    resident = pl.BlockSpec(memory_space=pltpu.MemorySpace.VMEM)  # single-buffered

    out = pl.pallas_call(
        kernel,
        out_shape=jax.ShapeDtypeStruct((B, s_pad, dp), out_dtype),
        grid=(B, num_blocks),
        in_specs=[
            pl.BlockSpec((1, blk_rows, d_model), lambda b, n: (b, n, 0)),  # x
            resident,                                                      # w_qkv_t
            resident,                                                      # b_qkv
            resident,                                                      # wo_t
            resident,                                                      # bo
            resident,                                                      # hsel
            resident,                                                      # hexp
            resident,                                                      # negmask
        ],
        out_specs=pl.BlockSpec((1, blk_rows, dp), lambda b, n: (b, n, 0)),
        compiler_params=pltpu.CompilerParams(
            dimension_semantics=("parallel", "parallel"),
            vmem_limit_bytes=vmem_budget),
    )(x_p, w_qkv_t, b_qkv, wo_t, bo, hsel, hexp, negmask)

    if s_pad != seq_len or dp != d_model:
        out = out[:, :seq_len, :d_model]
    return out


def reference(x, params, *, num_heads, segment_size, dilation_rate):
    """Pure-JAX (f32) reference of the same (fixed-scatter) semantics."""
    B, S, D = x.shape
    hd = D // num_heads
    scaling = hd ** (-0.5)
    q = x @ params["wq"].T + params["bq"]
    k = x @ params["wk"].T + params["bk"]
    v = x @ params["wv"].T + params["bv"]
    pad = (-S) % segment_size
    q = jnp.pad(q, ((0, 0), (0, pad), (0, 0)))
    k = jnp.pad(k, ((0, 0), (0, pad), (0, 0)))
    v = jnp.pad(v, ((0, 0), (0, pad), (0, 0)))
    sp = S + pad
    n = sp // segment_size
    q = q.reshape(B, n, segment_size, num_heads, hd)
    k = k.reshape(B, n, segment_size, num_heads, hd)
    v = v.reshape(B, n, segment_size, num_heads, hd)
    outs = jnp.zeros((B, n, segment_size, num_heads, hd), jnp.float32)
    for j in range(num_heads):
        sj = j % dilation_rate
        if sj >= segment_size:
            continue
        qs = q[:, :, sj::dilation_rate, j]
        ks = k[:, :, sj::dilation_rate, j]
        vs = v[:, :, sj::dilation_rate, j]
        scores = jnp.einsum("bnsl,bnsl->bns", qs, ks) * scaling
        probs = jax.nn.softmax(scores, axis=-1)
        ao = probs[..., None] * vs
        outs = outs.at[:, :, sj::dilation_rate, j, :].set(ao)
    outputs = outs.reshape(B, sp, D)[:, :S, :]
    return outputs @ params["wo"].T + params["bo"]


if __name__ == "__main__":
    d_model, num_heads, segment_size, dilation_rate = 32, 4, 8, 2
    batch, seq_len = 2, 16

    key = jax.random.PRNGKey(0)
    ks = jax.random.split(key, 9)
    params = {
        "wq": jax.random.normal(ks[0], (d_model, d_model), jnp.float32) * 0.05,
        "wk": jax.random.normal(ks[1], (d_model, d_model), jnp.float32) * 0.05,
        "wv": jax.random.normal(ks[2], (d_model, d_model), jnp.float32) * 0.05,
        "wo": jax.random.normal(ks[3], (d_model, d_model), jnp.float32) * 0.05,
        "bq": jax.random.normal(ks[4], (d_model,), jnp.float32) * 0.05,
        "bk": jax.random.normal(ks[5], (d_model,), jnp.float32) * 0.05,
        "bv": jax.random.normal(ks[6], (d_model,), jnp.float32) * 0.05,
        "bo": jax.random.normal(ks[7], (d_model,), jnp.float32) * 0.05,
    }
    x = jax.random.normal(ks[8], (batch, seq_len, d_model), jnp.float32)

    out = multi_head_dilated_attention(
        x, params, num_heads=num_heads, segment_size=segment_size,
        dilation_rate=dilation_rate)
    out = jax.block_until_ready(out)

    ref = reference(
        x, params, num_heads=num_heads, segment_size=segment_size,
        dilation_rate=dilation_rate)

    assert out.shape == (batch, seq_len, d_model), out.shape
    if not bool(jnp.allclose(out.astype(jnp.float32), ref, rtol=2e-2, atol=2e-2)):
        raise AssertionError("Pallas kernel does not match JAX reference")
    print("KERNEL_OK")
</pallas_src>

<mosaic_0001>
module attributes {stable_mosaic.version = 11 : i64} {
  func.func @_mhda_kernel(%arg0: i32, %arg1: i32, %arg2: memref<1x16x32xf32, #tpu.memory_space<vmem>>, %arg3: memref<32x384xbf16, #tpu.memory_space<vmem>>, %arg4: memref<1x384xf32, #tpu.memory_space<vmem>>, %arg5: memref<128x128xbf16, #tpu.memory_space<vmem>>, %arg6: memref<1x128xf32, #tpu.memory_space<vmem>>, %arg7: memref<128x128xf32, #tpu.memory_space<vmem>>, %arg8: memref<128x128xbf16, #tpu.memory_space<vmem>>, %arg9: memref<16x128xf32, #tpu.memory_space<vmem>>, %arg10: memref<1x16x128xbf16, #tpu.memory_space<vmem>>) attributes {dimension_semantics = [#tpu.dimension_semantics<parallel>, #tpu.dimension_semantics<parallel>], iteration_bounds = array<i64: 2, 1>, scalar_prefetch = 0 : i64, scratch_operands = 0 : i64, tpu.core_type = #tpu.core_type<tc>, window_params = [{transform_indices = @transform_0, window_bounds = array<i64: 1, 16, 32>}, {pipeline_mode = #tpu.pipeline_mode<synchronous>, transform_indices = @transform_1, window_bounds = array<i64: 32, 384>}, {pipeline_mode = #tpu.pipeline_mode<synchronous>, transform_indices = @transform_2, window_bounds = array<i64: 1, 384>}, {pipeline_mode = #tpu.pipeline_mode<synchronous>, transform_indices = @transform_3, window_bounds = array<i64: 128, 128>}, {pipeline_mode = #tpu.pipeline_mode<synchronous>, transform_indices = @transform_4, window_bounds = array<i64: 1, 128>}, {pipeline_mode = #tpu.pipeline_mode<synchronous>, transform_indices = @transform_5, window_bounds = array<i64: 128, 128>}, {pipeline_mode = #tpu.pipeline_mode<synchronous>, transform_indices = @transform_6, window_bounds = array<i64: 128, 128>}, {pipeline_mode = #tpu.pipeline_mode<synchronous>, transform_indices = @transform_7, window_bounds = array<i64: 16, 128>}, {transform_indices = @transform_8, window_bounds = array<i64: 1, 16, 128>}]} {
    %c0 = arith.constant 0 : index
    %c0_0 = arith.constant 0 : index
    %c0_1 = arith.constant 0 : index
    %0 = vector.load %arg2[%c0, %c0_0, %c0_1] : memref<1x16x32xf32, #tpu.memory_space<vmem>>, vector<1x16x32xf32>
    %1 = vector.shape_cast %0 : vector<1x16x32xf32> to vector<16x32xf32>
    %2 = arith.truncf %1 : vector<16x32xf32> to vector<16x32xbf16>
    %c0_2 = arith.constant 0 : index
    %c0_3 = arith.constant 0 : index
    %3 = vector.load %arg3[%c0_2, %c0_3] : memref<32x384xbf16, #tpu.memory_space<vmem>>, vector<32x384xbf16>
    %cst = arith.constant dense<0.000000e+00> : vector<16x384xf32>
    %4 = tpu.matmul %2, %3, %cst {dimension_numbers = #tpu.dot_dimension_numbers<[1], [0], [0], [1], [0, 0, 1, 1], [], []>} : vector<16x32xbf16>, vector<32x384xbf16>, vector<16x384xf32> -> vector<16x384xf32>
    %c0_4 = arith.constant 0 : index
    %c0_5 = arith.constant 0 : index
    %5 = vector.load %arg4[%c0_4, %c0_5] : memref<1x384xf32, #tpu.memory_space<vmem>>, vector<1x384xf32>
    %6 = vector.broadcast %5 : vector<1x384xf32> to vector<16x384xf32>
    %7 = arith.addf %4, %6 : vector<16x384xf32>
    %8 = vector.extract_strided_slice %7 {offsets = [0, 0], sizes = [16, 128], strides = [1, 1]} : vector<16x384xf32> to vector<16x128xf32>
    %9 = vector.extract_strided_slice %7 {offsets = [0, 128], sizes = [16, 128], strides = [1, 1]} : vector<16x384xf32> to vector<16x128xf32>
    %10 = vector.extract_strided_slice %7 {offsets = [0, 256], sizes = [16, 128], strides = [1, 1]} : vector<16x384xf32> to vector<16x128xf32>
    %11 = arith.truncf %10 : vector<16x128xf32> to vector<16x128xbf16>
    %12 = arith.mulf %8, %9 : vector<16x128xf32>
    %c0_6 = arith.constant 0 : index
    %c0_7 = arith.constant 0 : index
    %13 = vector.load %arg7[%c0_6, %c0_7] : memref<128x128xf32, #tpu.memory_space<vmem>>, vector<128x128xf32>
    %cst_8 = arith.constant dense<0.000000e+00> : vector<16x128xf32>
    %14 = tpu.matmul %12, %13, %cst_8 {dimension_numbers = #tpu.dot_dimension_numbers<[1], [0], [0], [1], [0, 0, 1, 1], [], []>} : vector<16x128xf32>, vector<128x128xf32>, vector<16x128xf32> -> vector<16x128xf32>
    %c0_9 = arith.constant 0 : index
    %c0_10 = arith.constant 0 : index
    %15 = vector.load %arg9[%c0_9, %c0_10] : memref<16x128xf32, #tpu.memory_space<vmem>>, vector<16x128xf32>
    %16 = arith.addf %14, %15 : vector<16x128xf32>
    %17 = vector.shape_cast %16 : vector<16x128xf32> to vector<2x8x128xf32>
    %cst_11 = arith.constant dense<0xFF800000> : vector<2x128xf32>
    %18 = vector.multi_reduction <maximumf>, %17, %cst_11 [1] : vector<2x8x128xf32> to vector<2x128xf32>
    %19 = vector.shape_cast %18 : vector<2x128xf32> to vector<2x1x128xf32>
    %20 = vector.broadcast %19 : vector<2x1x128xf32> to vector<2x8x128xf32>
    %21 = arith.subf %17, %20 : vector<2x8x128xf32>
    %22 = math.exp %21 : vector<2x8x128xf32>
    %cst_12 = arith.constant dense<0.000000e+00> : vector<2x128xf32>
    %23 = vector.multi_reduction <add>, %22, %cst_12 [1] : vector<2x8x128xf32> to vector<2x128xf32>
    %24 = vector.shape_cast %23 : vector<2x128xf32> to vector<2x1x128xf32>
    %25 = tpu.reciprocal %24 {approx = true} : vector<2x1x128xf32> -> vector<2x1x128xf32>
    %26 = vector.broadcast %25 : vector<2x1x128xf32> to vector<2x8x128xf32>
    %27 = arith.mulf %22, %26 : vector<2x8x128xf32>
    %28 = vector.shape_cast %27 : vector<2x8x128xf32> to vector<16x128xf32>
    %29 = arith.truncf %28 : vector<16x128xf32> to vector<16x128xbf16>
    %c0_13 = arith.constant 0 : index
    %c0_14 = arith.constant 0 : index
    %30 = vector.load %arg8[%c0_13, %c0_14] : memref<128x128xbf16, #tpu.memory_space<vmem>>, vector<128x128xbf16>
    %cst_15 = arith.constant dense<0.000000e+00> : vector<16x128xf32>
    %31 = tpu.matmul %29, %30, %cst_15 {dimension_numbers = #tpu.dot_dimension_numbers<[1], [0], [0], [1], [0, 0, 1, 1], [], []>} : vector<16x128xbf16>, vector<128x128xbf16>, vector<16x128xf32> -> vector<16x128xf32>
    %32 = arith.extf %11 : vector<16x128xbf16> to vector<16x128xf32>
    %33 = arith.mulf %31, %32 : vector<16x128xf32>
    %34 = arith.truncf %33 : vector<16x128xf32> to vector<16x128xbf16>
    %c0_16 = arith.constant 0 : index
    %c0_17 = arith.constant 0 : index
    %35 = vector.load %arg5[%c0_16, %c0_17] : memref<128x128xbf16, #tpu.memory_space<vmem>>, vector<128x128xbf16>
    %cst_18 = arith.constant dense<0.000000e+00> : vector<16x128xf32>
    %36 = tpu.matmul %34, %35, %cst_18 {dimension_numbers = #tpu.dot_dimension_numbers<[1], [0], [0], [1], [0, 0, 1, 1], [], []>} : vector<16x128xbf16>, vector<128x128xbf16>, vector<16x128xf32> -> vector<16x128xf32>
    %c0_19 = arith.constant 0 : index
    %c0_20 = arith.constant 0 : index
    %37 = vector.load %arg6[%c0_19, %c0_20] : memref<1x128xf32, #tpu.memory_space<vmem>>, vector<1x128xf32>
    %38 = vector.broadcast %37 : vector<1x128xf32> to vector<16x128xf32>
    %39 = arith.addf %36, %38 : vector<16x128xf32>
    %40 = arith.truncf %39 : vector<16x128xf32> to vector<16x128xbf16>
    %c0_21 = arith.constant 0 : index
    %c0_22 = arith.constant 0 : index
    %c0_23 = arith.constant 0 : index
    %41 = vector.load %arg10[%c0_21, %c0_22, %c0_23] : memref<1x16x128xbf16, #tpu.memory_space<vmem>>, vector<1x16x128xbf16>
    %42 = vector.shape_cast %41 : vector<1x16x128xbf16> to vector<16x128xbf16>
    %43 = vector.shape_cast %40 : vector<16x128xbf16> to vector<1x16x128xbf16>
    tpu.vector_store %arg10[%c0_21, %c0_22, %c0_23], %43 {strides = array<i32>} : memref<1x16x128xbf16, #tpu.memory_space<vmem>>, vector<1x16x128xbf16>,
    return
  }
  func.func @transform_0(%arg0: i32, %arg1: i32) -> (i32, i32, i32) {
    %c0_i32 = arith.constant 0 : i32
    %c0_i32_0 = arith.constant 0 : i32
    return %arg0, %arg1, %c0_i32 : i32, i32, i32
  }
  func.func @transform_1(%arg0: i32, %arg1: i32) -> (i32, i32) {
    %c0_i32 = arith.constant 0 : i32
    %c0_i32_0 = arith.constant 0 : i32
    %c0_i32_1 = arith.constant 0 : i32
    return %c0_i32, %c0_i32_0 : i32, i32
  }
  func.func @transform_2(%arg0: i32, %arg1: i32) -> (i32, i32) {
    %c0_i32 = arith.constant 0 : i32
    %c0_i32_0 = arith.constant 0 : i32
    %c0_i32_1 = arith.constant 0 : i32
    return %c0_i32, %c0_i32_0 : i32, i32
  }
  func.func @transform_3(%arg0: i32, %arg1: i32) -> (i32, i32) {
    %c0_i32 = arith.constant 0 : i32
    %c0_i32_0 = arith.constant 0 : i32
    %c0_i32_1 = arith.constant 0 : i32
    return %c0_i32, %c0_i32_0 : i32, i32
  }
  func.func @transform_4(%arg0: i32, %arg1: i32) -> (i32, i32) {
    %c0_i32 = arith.constant 0 : i32
    %c0_i32_0 = arith.constant 0 : i32
    %c0_i32_1 = arith.constant 0 : i32
    return %c0_i32, %c0_i32_0 : i32, i32
  }
  func.func @transform_5(%arg0: i32, %arg1: i32) -> (i32, i32) {
    %c0_i32 = arith.constant 0 : i32
    %c0_i32_0 = arith.constant 0 : i32
    %c0_i32_1 = arith.constant 0 : i32
    return %c0_i32, %c0_i32_0 : i32, i32
  }
  func.func @transform_6(%arg0: i32, %arg1: i32) -> (i32, i32) {
    %c0_i32 = arith.constant 0 : i32
    %c0_i32_0 = arith.constant 0 : i32
    %c0_i32_1 = arith.constant 0 : i32
    return %c0_i32, %c0_i32_0 : i32, i32
  }
  func.func @transform_7(%arg0: i32, %arg1: i32) -> (i32, i32) {
    %c0_i32 = arith.constant 0 : i32
    %c0_i32_0 = arith.constant 0 : i32
    %c0_i32_1 = arith.constant 0 : i32
    return %c0_i32, %c0_i32_0 : i32, i32
  }
  func.func @transform_8(%arg0: i32, %arg1: i32) -> (i32, i32, i32) {
    %c0_i32 = arith.constant 0 : i32
    %c0_i32_0 = arith.constant 0 : i32
    return %arg0, %arg1, %c0_i32 : i32, i32, i32
  }
}

</mosaic_0001>

<bundles_post_ra>
// kernel: tpu_custom_call.1
= control target key start
LH: loop header
LB: loop body
LE: loop exit
PB: predicated region body
PF: predicated region fallthrough
CT: control target
= control target key end

     0   :  { %s1810_s0 = inlined_call_operand.hbm [shape: f32[2,16,32], index: 0, kind: input, shape index: {}]   ;;  %s1811_s1 = inlined_call_operand.hbm [shape: bf16[32,384], index: 1, kind: input, shape index: {}]   ;;  %s1812_s2 = inlined_call_operand.hbm [shape: f32[1,384], index: 2, kind: input, shape index: {}]   ;;  %s1813_s3 = inlined_call_operand.hbm [shape: bf16[128,128], index: 3, kind: input, shape index: {}]   ;;  %s1814_s4 = inlined_call_operand.vmem [shape: f32[1,128], index: 4, kind: input, shape index: {}]   ;;  %s1815_s5 = inlined_call_operand.hbm [shape: f32[128,128], index: 5, kind: input, shape index: {}]   ;;  %s1816_s6 = inlined_call_operand.hbm [shape: bf16[128,128], index: 6, kind: input, shape index: {}]   ;;  %s1817_s7 = inlined_call_operand.hbm [shape: f32[16,128], index: 7, kind: input, shape index: {}]   ;;  %s1818_s8 = inlined_call_operand.hbm [shape: bf16[2,16,128], index: 8, kind: output, shape index: {}]  }
   0x1   :  { %1821 = sst [smem:[#allocation20_spill]] %s1811_s1 }
   0x2   :  { %1822 = sst [smem:[#allocation21_spill]] %s1812_s2 }
   0x3   :  { %1823 = sst [smem:[#allocation22_spill]] %s1813_s3 }
   0x4   :  { %1824 = sst [smem:[#allocation23_spill]] %s1814_s4 }
   0x5   :  { %13 = vsyncpa [#allocation3], 0 }
   0x6   :  { %15 = vsyncpa [#allocation3 + $0x1], 0 }
   0x7   :  { %16 = vsyncpa [#allocation6], 0 }
   0x8   :  { %17 = vsyncpa [#allocation9], 0 }
   0x9   :  { %18 = vsyncpa [#allocation12], 0 }
   0xa   :  { %19 = vsyncpa [#allocation4], 0 }
   0xb   :  { %21 = vsyncpa [#allocation4 + $0x1], 0  ;;  %s1604_s27 = smov 0   ;;  %s1606_s28 = smov 0  }
   0xc   :  { %s1608_s29 = smov 0   ;;  %s1610_s30 = smov 0  }
   0xd   :  { %s1612_s9 = smov 0   ;;  %s1614_s10 = smov 0  }
   0xe LB: > { %s1819_s11 = sadd.s32 4294967295, %s1543_s10   ;;  %p954_p0 = scmp.ge.s32.totalorder %s1543_s10, 1  ;;  %s1543_s10 = sphi %s1614_s10, %s27_s10   ;;  %s1539_s9 = sphi %s1612_s9, %s1841_s9   ;;  %s1535_s30 = sphi %s1610_s30, %s1840_s30   ;;  %s1531_s29 = sphi %s1608_s29, %s1839_s29   ;;  %s1527_s28 = sphi %s1606_s28, %s1838_s28   ;;  %s1523_s27 = sphi %s1604_s27, %s1837_s27  }
   0xf   : > { %p1638_p1 = scmp.eq.s32.totalorder %s1819_s11, 0  ;;  %p247_p2 = scmp.lt.s32.totalorder %s1543_s10, 3 }
  0x10   : > { %s1826_s1 = sld [smem:[#allocation20_spill]]  ;;  %s1545_s17 = smov [#allocation5]  }
  0x11   : > { %p1646_p3 = pnand %p954_p0, %p247_p2  ;;  %s260_s18 = sshll.u32 %s1545_s17, 4  ;;  %s261_s18 = int_to_ptr.vmem [resolvable:$true] %s260_s18 }
  0x12   : > { %p961_p6 = scmp.ge.s32.totalorder %s1543_s10, 2  ;;  %s1829_s3 = sld [smem:[#allocation22_spill]] }
  0x13   : > { %p1127_p4 = pneg %p1646_p3  ;;  %s1546_s23 = smov 192  }
  0x14   : > { %s1547_s24 = smov 12   ;;  %s1548_s25 = smov [#allocation8]  }
  0x15   : > { %p1654_p5 = pnand %p1127_p4, %p1638_p1  ;;  %s286_s26 = sshll.u32 %s1548_s25, 4  ;;  %s287_s26 = int_to_ptr.vmem [resolvable:$true] %s286_s26 }
  0x16   : > { %s258_s15 = sshll.u32 %s1826_s1, 4  ;;  %s1549_s13 = smov 64   ;;  %s259_s15 = int_to_ptr.hbm [resolvable:$true] %s258_s15 }
  0x17   : > { %1130 = dma.hbm_to_vmem [thread:$0]  (!%p1654_p5), %s259_s15, 768, %s261_s18, [#allocation6], %s1546_s23, %s1546_s23, %s1547_s24  }
  0x18   : > { %s284_s22 = sshll.u32 %s1829_s3, 4  ;;  %s1550_s14 = smov 4   ;;  %s285_s22 = int_to_ptr.hbm [resolvable:$true] %s284_s22 }
  0x19   : > { %1136 = dma.hbm_to_vmem [thread:$0]  (!%p1654_p5), %s285_s22, 1024, %s287_s26, [#allocation9], %s1549_s13, %s1549_s13, %s1550_s14  }
  0x1a   : > { %s315_s1 = sshll.u32 %s1816_s6, 4  ;;  %s1551_s20 = smov [#allocation11]   ;;  %s316_s1 = int_to_ptr.hbm [resolvable:$true] %s315_s1 }
  0x1b   : > { %s317_s21 = sshll.u32 %s1551_s20, 4  ;;  %s1830_s2 = sld [smem:[#allocation21_spill]]  ;;  %s318_s21 = int_to_ptr.vmem [resolvable:$true] %s317_s21 }
  0x1c   : > { %1142 = dma.hbm_to_vmem [thread:$0]  (!%p1654_p5), %s316_s1, 1024, %s318_s21, [#allocation12], %s1549_s13, %s1549_s13, %s1550_s14  }
  0x1d   : > { %s1552_s18 = smov [#allocation7]   ;;  %s301_s11 = sshll.u32 %s1815_s5, 4  ;;  %s302_s11 = int_to_ptr.hbm [resolvable:$true] %s301_s11 }
  0x1e   : > { %s275_s23 = sshll.u32 %s1552_s18, 4  ;;  %s1553_s3 = smov [#allocation10]   ;;  %s276_s23 = int_to_ptr.vmem [resolvable:$true] %s275_s23 }
  0x1f   : > { %s303_s4 = sshll.u32 %s1553_s3, 4  ;;  %s329_s26 = sshll.u32 %s1817_s7, 4  ;;  %s304_s4 = int_to_ptr.vmem [resolvable:$true] %s303_s4  ;;  %s330_s26 = int_to_ptr.hbm [resolvable:$true] %s329_s26 }
  0x20   : > { %s1820_s13 = smov 128   ;;  %s1555_s14 = smov 8  }
  0x21   : > { %s273_s15 = sshll.u32 %s1830_s2, 4  ;;  %s1556_s17 = smov [#allocation13]   ;;  %s274_s15 = int_to_ptr.hbm [resolvable:$true] %s273_s15 }
  0x22   : > { %1133 = dma.hbm_to_vmem [thread:$0]  (!%p1654_p5), %s274_s15, 48, %s276_s23, [#allocation6]  }
  0x23   : > { %1139 = dma.hbm_to_vmem [thread:$0]  (!%p1654_p5), %s302_s11, 2048, %s304_s4, [#allocation9], %s1820_s13, %s1820_s13, %s1555_s14  }
  0x24   : > { %s331_s20 = sshll.u32 %s1556_s17, 4  ;;  %s39_s21 = sadd.s32 1, %s1539_s9  ;;  %s332_s20 = int_to_ptr.vmem [resolvable:$true] %s331_s20 }
  0x25   : > { %1145 = dma.hbm_to_vmem [thread:$0]  (!%p1654_p5), %s330_s26, 256, %s332_s20, [#allocation12], %s1820_s13, %s1820_s13, %s1555_s14  }
  0x26   : > { %s953_s15 = sadd.s32 4294967294, %s1543_s10   ;;  %p41_p7 = scmp.ge.s32.totalorder %s39_s21, 2 }
  0x27   : > { %s48_s18 = sadd.s32 1, %s1531_s29  ;;  %p55_p8 = scmp.ne.s32.totalorder %s1531_s29, %s1527_s28 }
  0x28   : > { %s1843_s21 = smov (%p41_p7, %s39_s21), 0  ;;  %p56_p9 = scmp.eq.s32.totalorder %s1543_s10, 0 }
  0x29   : > { %p61_p10 = scmp.ne.s32.totalorder %s1527_s28, %s1523_s27  ;;  %s43_s23 = ssub.s32 %s1539_s9, %s1843_s21 }
  0x2a   : > { %s1831_s19 = sadd.s32 4294967295, %s1543_s10   ;;  %p46_p12 = scmp.eq.s32.totalorder %s43_s23, 0 }
  0x2b   : > { %p234_p11 = scmp.eq.s32.totalorder %s1831_s19, 1  ;;  %p1708_p13 = por %p1638_p1, %p61_p10 }
  0x2c   : > { %p240_p2 = scmp.eq.s32.totalorder %s953_s15, 1  ;;  %p57_p4 = por %p56_p9, %p55_p8 }
  0x2d   : > { %p1712_p0 = por %p234_p11, %p55_p8  ;;  %s345_s4 = sand.u32 1, %s1531_s29  }
  0x2e   : > { %s1717_s11 = scalar_select %p46_p12, %s1531_s29, %s48_s18  }
  0x2f   : > { %p1719_p5 = por %p240_p2, %p61_p10  ;;  %s1070_s1 = sshll.u32 %s1539_s9, 4 }
  0x30   : > { %p1160_p7 = scmp.lt.s32.totalorder %s1543_s10, 2  ;;  %s962_s25 = sshll.u32 %s345_s4, 4 }
  0x31   : > { %s356_s20 = scalar_lea.hbm %s1810_s0, %s1070_s1  ;;  %s349_s19 = scalar_lea.vmem [#allocation2], %s962_s25 }
  0x32   : > { %s357_s23 = sshll.u32 %s356_s20, 4  ;;  %s359_s13 = sshll.u32 %s349_s19, 4  ;;  %s358_s23 = int_to_ptr.hbm [resolvable:$true] %s357_s23  ;;  %s360_s13 = int_to_ptr.vmem [resolvable:$true] %s359_s13 }
  0x33   : > { %p1147_p11 = pnand %p1160_p7, %p57_p4  ;;  %s346_s15 = scalar_lea.sflag [#allocation3], %s345_s4 }
  0x34   : > { %s1835_s18 = smov 128   ;;  %371 = sbr.rel (%p1646_p3) target bundleno = 678 (0x2a6), region = 52 }
  0x35   : > { %1149 = dma.hbm_to_vmem [thread:$0]  (!%p1147_p11), %s358_s23, 256, %s360_s13, %s346_s15, %s1835_s18, %s1835_s18, %s1555_s14  }
  0x36   : > { %s1735_s2 = sand.u32 (!%p1646_p3), 1, %s1527_s28  }
  0x37   : > { %s966_s1 = sshll.u32 (!%p1646_p3), %s1735_s2, 4  ;;  %s374_s25 = scalar_lea.sflag (!%p1646_p3), [#allocation3], %s1735_s2 }
  0x38   : > { %s377_s26 = scalar_lea.vmem (!%p1646_p3), [#allocation2], %s966_s1 }
  0x39   : > { %1502 = dma.done.wait (%p1708_p13), %s374_s25, 256  }
  0x3a   : > { %1504 = vsyncadd (%p1708_p13), %s374_s25, 4294967040 }
  0x3b   : > { %1506 = dma.done.wait (%p1638_p1), [#allocation6], 816  }
  0x3c   : > { %1508 = vsyncadd (%p1638_p1), [#allocation6], 4294966480 }
  0x3d   : > { %1510 = dma.done.wait (%p1638_p1), [#allocation9], 3072  }
  0x3e   : > { %1512 = vsyncadd (%p1638_p1), [#allocation9], 4294964224 }
  0x3f   : > { %1514 = dma.done.wait (%p1638_p1), [#allocation12], 1280  }
  0x40   : > { %1516 = vsyncadd (%p1638_p1), [#allocation12], 4294966016  ;;  %v988_v0 = vld [vmem:[#allocation5 + $0x18] sm:$0xf]  ;;  %v1075_v1 = vld [vmem:[#allocation5 + $0x20] sm:$0xf0] }
  0x41   : > { %v1074_v2 = vld [vmem:[#allocation5 + $0x1c] sm:$0xf]  ;;  %v989_v3 = vor.u32 %v1075_v1, %v988_v0  ;;  %v990_v4 = vld [vmem:[#allocation5 + $0x24] sm:$0xf0]  ;;  %v976_v5 = vld [vmem:[#allocation5] sm:$0xf] }
  0x42   : > { %v1072_v6 = vld [vmem:[#allocation5 + $0x8] sm:$0xf0]  ;;  %v993_v7 = vor.u32 %v1074_v2, %v990_v4  ;;  %v1071_v8 = vld [vmem:[#allocation5 + $0x4] sm:$0xf]  ;;  %v978_v9 = vld [vmem:[#allocation5 + $0xc] sm:$0xf0] }
  0x43   : > { %v444_v10 = vld [vmem:[%s377_s26] sm:$0xff]  ;;  %505 = vmatpush.bf16.msra.mxu2 %v989_v3  ;;  %v977_v11 = vor.u32 %v1072_v6, %v976_v5  ;;  %v445_v12 = vld [vmem:[%s377_s26 + $0x8] sm:$0xff]  ;;  %v981_v15 = vor.u32 %v1071_v8, %v978_v9  ;;  %vm495_vm0 = vcmask 261120   ;;  %s973_s12 = sshll.u32 %s1735_s2, 3  ;;  %s1093_s16 = sshll.u32 %s1535_s30, 3 }
  0x44   : > { %v560_v13 = vld [vmem:[#allocation10 + $0x78] sm:$0xff]  ;;  %v559_v14 = vld [vmem:[#allocation10 + $0x70] sm:$0xff]  ;;  %519 = vmatpush.bf16.msra.mxu1 %v993_v7  ;;  %v558_v16 = vld [vmem:[#allocation10 + $0x68] sm:$0xff]  ;;  %v1755_v17 = vpack.c.bf16 %v445_v12, %v444_v10  ;;  %s804_s24 = scalar_lea.hbm %s1818_s8, %s1093_s16  ;;  %s1836_s20 = sld [smem:[#allocation23_spill]] }
  0x45   : > { %563 = vmatpush.msra.mxu3 %v560_v13  ;;  %v557_v18 = vld [vmem:[#allocation10 + $0x60] sm:$0xff]  ;;  %v556_v19 = vld [vmem:[#allocation10 + $0x58] sm:$0xff]  ;;  %v555_v20 = vld [vmem:[#allocation10 + $0x50] sm:$0xff]  ;;  %s440_s23 = scalar_lea.vmem [#allocation14], %s973_s12  ;;  %s807_s15 = sshll.u32 %s804_s24, 4  ;;  %s808_s15 = int_to_ptr.hbm [resolvable:$true] %s807_s15 }
  0x46   : > { %v554_v21 = vld [vmem:[#allocation10 + $0x48] sm:$0xff]  ;;  %v553_v22 = vld [vmem:[#allocation10 + $0x40] sm:$0xff]  ;;  %v552_v23 = vld [vmem:[#allocation10 + $0x38] sm:$0xff]  ;;  %s805_s19 = sshll.u32 %s440_s23, 4  ;;  %s791_s30 = scalar_lea.sflag [#allocation4], %s1735_s2  ;;  %s806_s19 = int_to_ptr.vmem [resolvable:$true] %s805_s19 }
  0x47   : > { %564 = vmatpush.msra.mxu3 %v559_v14  ;;  %506 = vmatpush.bf16.msra.mxu2 %v977_v11  ;;  %v551_v24 = vld [vmem:[#allocation10 + $0x30] sm:$0xff]  ;;  %v550_v25 = vld [vmem:[#allocation10 + $0x28] sm:$0xff]  ;;  %v549_v26 = vld [vmem:[#allocation10 + $0x20] sm:$0xff]  ;;  %s1463_s18 = sshra.s32 %s808_s15, 4  ;;  %s1469_s12 = scalar_lea.hbm %s1818_s8, 16  ;;  %s1464_s18 = int_to_ptr.hbm [resolvable:$true] %s1463_s18 }
  0x48   : > { %520 = vmatpush.bf16.msra.mxu1 %v981_v15  ;;  %v548_v27 = vld [vmem:[#allocation10 + $0x18] sm:$0xff]  ;;  %v547_v28 = vld [vmem:[#allocation10 + $0x10] sm:$0xff]  ;;  %v546_v29 = vld [vmem:[#allocation10 + $0x8] sm:$0xff]  ;;  %s1465_s1 = scalar_lea.hbm %s1464_s18, 8  ;;  %p1470_p9 = scmp.lt.s32.totalorder %s1464_s18, %s1818_s8 }
  0x49   : > { %565 = vmatpush.msra.mxu3 %v558_v16  ;;  %v545_v30 = vld [vmem:[#allocation10] sm:$0xff]  ;;  %v1761_v31 = vld [vmem:[#allocation7] sm:$0x7]  ;;  %v996_v45 = vld [vmem:[#allocation5 + $0x20] sm:$0xf]  ;;  %p1466_p1 = scmp.ne.s32.totalorder %s1464_s18, %s1465_s1  ;;  %p1471_p10 = scmp.lt.s32.totalorder %s1469_s12, %s1465_s1 }
  0x4a   : > { %998 = vmatmul.msk.bf16.vlgmr.msra.gmra.mxu2 %vm495_vm0, %v1755_v17  ;;  %v458_v32 = vperm.slane %v1761_v31, 1  ;;  %v457_v34 = vperm.slane %v1761_v31, 0  ;;  %v1084_v44 = vld [vmem:[#allocation11 + $0x38] sm:$0xff]  ;;  %v1083_v47 = vld [vmem:[#allocation11 + $0x30] sm:$0xff]  ;;  %v1073_v50 = vld [vmem:[#allocation5 + $0x10] sm:$0xf0] }
  0x4b   : > { %566 = vmatpush.msra.mxu3 %v557_v18  ;;  %999 = vmatmul.msk.bf16.vlgmr.msra.gmra.mxu1 %vm495_vm0, %v1755_v17  ;;  %v1076_v46 = vld [vmem:[#allocation5 + $0x28] sm:$0xf0]  ;;  %v984_v49 = vld [vmem:[#allocation5 + $0x8] sm:$0xf]  ;;  %v561_v51 = vld [vmem:[#allocation13] sm:$0xff]  ;;  %p1467_p3 = pnand %p1466_p1, %p1712_p0  ;;  %p1472_p12 = por %p1471_p10, %p1470_p9 }
  0x4c   : > { %685 = vmatpush.bf16.msra.mxu0 %v1084_v44  ;;  %v997_v48 = vor.u32 %v1076_v46, %v996_v45  ;;  %v985_v52 = vor.u32 %v1073_v50, %v984_v49  ;;  %v1082_v53 = vld [vmem:[#allocation11 + $0x28] sm:$0xff]  ;;  %v1081_v57 = vld [vmem:[#allocation11 + $0x20] sm:$0xff]  ;;  %v1080_v61 = vld [vmem:[#allocation11 + $0x18] sm:$0xff]  ;;  %v459_v45 = vperm.slane %v1761_v31, 2 }
  0x4d   : > { %567 = vmatpush.msra.mxu3 %v556_v19  ;;  %v562_v59 = vld [vmem:[#allocation13 + $0x8] sm:$0xff]  ;;  %v1079_v3 = vld [vmem:[#allocation11 + $0x10] sm:$0xff]  ;;  %v1077_v12 = vld [vmem:[#allocation11] sm:$0xff]  ;;  %p1468_p8 = pneg %p1467_p3 }
  0x4e   : > { %533 = vmatpush.bf16.msrb.mxu2 %v997_v48  ;;  %v1078_v8 = vld [vmem:[#allocation11 + $0x8] sm:$0xff] }
  0x4f   : > { %568 = vmatpush.msra.mxu3 %v555_v20  ;;  %v1230_v31 = vld [vmem:[%s1836_s20] ss:$0 sm:$0xff]  ;;  %p1473_p13 = pnand %p1472_p12, %p1468_p8 }
  0x50   : > { %686 = vmatpush.bf16.msra.mxu0 %v1083_v47 }
  0x51   : > { %569 = vmatpush.msra.mxu3 %v554_v21 }
  0x52   : > { %534 = vmatpush.bf16.msrb.mxu2 %v985_v52 }
  0x53   : > { %570 = vmatpush.msra.mxu3 %v553_v22 }
  0x54   : > { %687 = vmatpush.bf16.msra.mxu0 %v1082_v53 }
  0x55   : > { %571 = vmatpush.msra.mxu3 %v552_v23 }
  0x57   : > { %572 = vmatpush.msra.mxu3 %v551_v24 }
  0x58   : > { %688 = vmatpush.bf16.msra.mxu0 %v1081_v57 }
  0x59   : > { %573 = vmatpush.msra.mxu3 %v550_v25 }
  0x5a   : > { %1000 = vmatmul.msk.bf16.vlgmr.msrb.gmra.mxu2 %vm495_vm0, %v1755_v17  ;;  %v1092_v17 = vld [vmem:[#allocation8 + $0x38] sm:$0xff] }
  0x5b   : > { %574 = vmatpush.msra.mxu3 %v549_v26  ;;  %772 = vmatpush.bf16.msrb.mxu1 %v1092_v17 }
  0x5c   : > { %689 = vmatpush.bf16.msra.mxu0 %v1080_v61 }
  0x5d   : > { %575 = vmatpush.msra.mxu3 %v548_v27 }
  0x5f   : > { %576 = vmatpush.msra.mxu3 %v547_v28 }
  0x60   : > { %690 = vmatpush.bf16.msra.mxu0 %v1079_v3 }
  0x61   : > { %577 = vmatpush.msra.mxu3 %v546_v29 }
  0x63   : > { %578 = vmatpush.msra.mxu3 %v545_v30 }
  0x64   : > { %691 = vmatpush.bf16.msra.mxu0 %v1078_v8 }
  0x68   : > { %692 = vmatpush.bf16.msra.mxu0 %v1077_v12 }
  0xc8   : > { %v522_v33 = vpop.f32.mrf.mxu1 }
  0xc9   : > { %v523_v35 = vadd.f32 %v522_v33, %v458_v32 }
  0xcd   : > { %v508_v36 = vpop.f32.mrf.mxu2 }
  0xce   : > { %v509_v37 = vadd.f32 %v508_v36, %v457_v34 }
  0xd0   : > { %v543_v38 = vmul.f32 %v523_v35, %v509_v37  ;;  %v524_v39 = vpop.f32.mrf.mxu1  ;;  %v1091_v37 = vld [vmem:[#allocation8 + $0x30] sm:$0xff] }
  0xd1   : > { %v525_v41 = vadd.f32 %v524_v39, %v458_v32  ;;  %773 = vmatpush.bf16.msrb.mxu1 %v1091_v37  ;;  %v1089_v39 = vld [vmem:[#allocation8 + $0x20] sm:$0xff] }
  0xd2   : > { %579 = vmatmul.f32.vlgmr.msra.gmra.mxu3 %v543_v38  ;;  %v1090_v38 = vld [vmem:[#allocation8 + $0x28] sm:$0xff] }
  0xd5   : > { %v510_v40 = vpop.f32.mrf.mxu2  ;;  %774 = vmatpush.bf16.msrb.mxu1 %v1090_v38 }
  0xd6   : > { %v511_v42 = vadd.f32 %v510_v40, %v457_v34  ;;  %v1088_v40 = vld [vmem:[#allocation8 + $0x18] sm:$0xff] }
  0xd8   : > { %v544_v43 = vmul.f32 %v525_v41, %v511_v42  ;;  %v1087_v41 = vld [vmem:[#allocation8 + $0x10] sm:$0xff]  ;;  %v1086_v42 = vld [vmem:[#allocation8 + $0x8] sm:$0xff] }
  0xd9   : > { %775 = vmatpush.bf16.msrb.mxu1 %v1089_v39 }
  0xda   : > { %582 = vmatmul.f32.gmra.mxu3 %v544_v43  ;;  %v1085_v43 = vld [vmem:[#allocation8] sm:$0xff] }
  0xdd   : > { %776 = vmatpush.bf16.msrb.mxu1 %v1088_v40  ;;  %v536_v44 = vpop.f32.mrf.mxu2 }
  0xde   : > { %v537_v47 = vadd.f32 %v536_v44, %v459_v45 }
  0xe0   : > { %v541_v50 = vpack.c.bf16 %v537_v47, %v537_v47 }
  0xe1   : > { %777 = vmatpush.bf16.msrb.mxu1 %v1087_v41 }
  0xe2   : > { %v699_v52 = vunpack.c.l.bf16 %v541_v50 }
  0xe5   : > { %778 = vmatpush.bf16.msrb.mxu1 %v1086_v42  ;;  %v538_v46 = vpop.f32.mrf.mxu2 }
  0xe6   : > { %v539_v48 = vadd.f32 %v538_v46, %v459_v45 }
  0xe9   : > { %779 = vmatpush.bf16.msrb.mxu1 %v1085_v43 }
 0x155   : > { %v580_v54 = vpop.f32.mrf.mxu3 }
 0x156   : > { %v581_v55 = vadd.f32 %v580_v54, %v561_v51  ;;  %v542_v51 = vpack.c.bf16 %v539_v48, %v539_v48 }
 0x158   : > { %v586_v56 = vrot.slane %v581_v55, 4  ;;  %v700_v53 = vunpack.c.l.bf16 %v542_v51 }
 0x15a   : > { %v587_v58 = vmax.f32 %v581_v55, %v586_v56 }
 0x15c   : > { %v588_v60 = vrot.slane %v587_v58, 2 }
 0x15d   : > { %v583_v62 = vpop.f32.mrf.mxu3 }
 0x15e   : > { %v589_v63 = vmax.f32 %v587_v58, %v588_v60  ;;  %v584_v0 = vadd.f32 %v583_v62, %v562_v59 }
 0x160   : > { %v590_v1 = vrot.slane %v589_v63, 1  ;;  %v592_v2 = vrot.slane %v584_v0, 4 }
 0x162   : > { %v591_v4 = vmax.f32 %v589_v63, %v590_v1  ;;  %v593_v5 = vmax.f32 %v584_v0, %v592_v2 }
 0x164   : > { %v598_v6 = vsub.f32 %v581_v55, %v591_v4  ;;  %v594_v7 = vrot.slane %v593_v5, 2 }
 0x166   : > { %v600_v9 = vmul.f32 1.442695, %v598_v6  ;;  %v595_v10 = vmax.f32 %v593_v5, %v594_v7 }
 0x168   : > { %1231 = vpow2.f32 %v600_v9  ;;  %v596_v11 = vrot.slane %v595_v10, 1 }
 0x16a   : > { %v597_v13 = vmax.f32 %v595_v10, %v596_v11 }
 0x16c   : > { %v599_v14 = vsub.f32 %v584_v0, %v597_v13 }
 0x16e   : > { %v1232_v15 = vpop.eup %1231  ;;  %v602_v16 = vmul.f32 1.442695, %v599_v14 }
 0x16f   : > { %v604_v18 = vrot.slane %v1232_v15, 4 }
 0x170   : > { %1233 = vpow2.f32 %v602_v16 }
 0x171   : > { %v605_v19 = vadd.f32 %v1232_v15, %v604_v18 }
 0x173   : > { %v606_v20 = vrot.slane %v605_v19, 2 }
 0x175   : > { %v607_v21 = vadd.f32 %v606_v20, %v605_v19 }
 0x176   : > { %v1234_v22 = vpop.eup %1233 }
 0x177   : > { %v610_v23 = vrot.slane %v1234_v22, 4  ;;  %v608_v24 = vrot.slane %v607_v21, 1 }
 0x179   : > { %v611_v25 = vadd.f32 %v1234_v22, %v610_v23  ;;  %v609_v27 = vadd.f32 %v608_v24, %v607_v21 }
 0x17b   : > { %v612_v26 = vrot.slane %v611_v25, 2  ;;  %1235 = vrcp.f32 %v609_v27 }
 0x17d   : > { %v613_v28 = vadd.f32 %v612_v26, %v611_v25 }
 0x17f   : > { %v614_v29 = vrot.slane %v613_v28, 1 }
 0x181   : > { %v615_v30 = vadd.f32 %v614_v29, %v613_v28  ;;  %v1236_v32 = vpop.eup %1235 }
 0x182   : > { %v618_v34 = vmul.f32 %v1236_v32, %v1232_v15 }
 0x183   : > { %1237 = vrcp.f32 %v615_v30 }
 0x189   : > { %v1238_v33 = vpop.eup %1237 }
 0x18a   : > { %v619_v35 = vmul.f32 %v1238_v33, %v1234_v22 }
 0x18c   : > { %v620_v36 = vpack.c.bf16 %v619_v35, %v618_v34 }
 0x18e   : > { %693 = vmatmul.bf16.vlgmr.msra.gmra.mxu0 %v620_v36 }
 0x20b   : > { %v694_v49 = vpop.f32.mrf.mxu0 }
 0x20c   : > { %v701_v55 = vmul.f32 %v699_v52, %v694_v49 }
 0x213   : > { %v696_v54 = vpop.f32.mrf.mxu0 }
 0x214   : > { %v702_v56 = vmul.f32 %v700_v53, %v696_v54 }
 0x216   : > { %v703_v57 = vpack.c.bf16 %v702_v56, %v701_v55 }
 0x218   : > { %780 = vmatmul.bf16.vlgmr.msrb.gmra.mxu1 %v703_v57 }
 0x295   : > { %v781_v58 = vpop.f32.mrf.mxu1 }
 0x296   : > { %v782_v60 = vadd.f32 %v1230_v31, %v781_v58 }
 0x29d   : > { %v783_v59 = vpop.f32.mrf.mxu1 }
 0x29e   : > { %v784_v61 = vadd.f32 %v1230_v31, %v783_v59 }
 0x2a0   : > { %v1097_v62 = vpack.c.bf16 %v784_v61, %v782_v60 }
 0x2a2   : > { %1098 = vst [vmem:[%s440_s23] sm:$0xff] %v1097_v62  }
 0x2a3   : > { %1476 = shalt.err (!%p1473_p13)
}
 0x2a4   : > { %s1557_s2 = smov 64   ;;  %s1558_s14 = smov 4  }
 0x2a5   : > { %1125 = dma.vmem_to_hbm [thread:$0]  (%p1712_p0), %s806_s19, 128, %s808_s15, %s791_s30, %s1557_s2, %s1557_s2, %s1558_s14  }
 0x2a6 PF: > { %s822_s24 = sand.u32 1, %s1523_s27   ;;  %p1151_p2 = pnand %p961_p6, %p1719_p5 }
 0x2a7   : > { %s823_s4 = scalar_lea.sflag [#allocation4], %s822_s24 }
 0x2a8   : > { %p1152_p4 = pneg %p1151_p2 }
 0x2aa   : > { %1518 = dma.done.wait (%p1152_p4), %s823_s4, 128  }
 0x2ab   : > { %1520 = vsyncadd (%p1152_p4), %s823_s4, 4294967168  ;;  %s27_s10 = sadd.s32 1, %s1543_s10   ;;  %s1837_s27 = smov %s1527_s28 }
 0x2ac   : > { %p24_p7 = scmp.ge.s32.totalorder %s27_s10, 4   ;;  %s1838_s28 = smov %s1531_s29 }
 0x2ad   : > { %s1839_s29 = smov %s1717_s11  ;;  %s1840_s30 = smov %s1539_s9 }
 0x2ae   : > { %s1841_s9 = smov %s1843_s21  ;;  %26 = sbr.rel (!%p24_p7) target bundleno = 14 (0xe), region = 121 }
 0x2b3   :  { %829 = vsyncpa [#allocation3], 1 }
 0x2b4   :  { %831 = vsyncpa [#allocation3 + $0x1], 1 }
 0x2b5   :  { %832 = vsyncpa [#allocation6], 1 }
 0x2b6   :  { %833 = vsyncpa [#allocation9], 1 }
 0x2b7   :  { %834 = vsyncpa [#allocation12], 1 }
 0x2b8   :  { %835 = vsyncpa [#allocation4], 1 }
 0x2b9   :  { %837 = vsyncpa [#allocation4 + $0x1], 1 }

</bundles_post_ra>
